<compile_context>
chip_gen: v7x
topology: tpu7x:2x2x1
jax: 0.10.0
libtpu: 0.0.40
codegen_flags: <defaults>
</compile_context>

<pallas_src>
import functools
import math

import jax
import jax.numpy as jnp
from jax.experimental import pallas as pl
from jax.experimental.pallas import tpu as pltpu

LANE = 128
BN_EPS = 1e-5


def _round_up(x, m):
    return (x + m - 1) // m * m


def _vmem_capacity_bytes():
    """Per-TensorCore VMEM capacity (v5e/v6e: 128 MiB, v7x: 64 MiB)."""
    try:
        cap = getattr(pltpu.get_tpu_info(), "vmem_capacity_bytes", None)
        if cap:
            return int(cap)
    except Exception:
        pass
    return 64 * 2**20  # conservative fallback (v7x per-core size)


# ----------------------------------------------------------------------------
# Fused whole-model kernel (grid-less: every operand lives in VMEM exactly once).
#   x_ref    : (N, F_pad)            node features            (mm_dtype)
#   adj_ref  : (N, N)                normalized adjacency     (mm_dtype)
#   win_ref  : (F_pad, 2*H_pad)      input layer  [W | W_self] (mm_dtype)
#   bin_ref  : (1, H_pad)            folded BN/bias            (f32)
#   wblk_ref : (L, H_pad, 2*H_pad)   mid-block layers          (mm_dtype)
#   bblk_ref : (L, 1, H_pad)                                   (f32)
#   wout_ref : (H_pad, 2*C_pad)      output layer              (mm_dtype)
#   bout_ref : (1, C_pad)                                      (f32)
#   o_ref    : (N, C_pad)                                      (f32)
# ----------------------------------------------------------------------------
def _fused_gcn_model_kernel(x_ref, adj_ref, win_ref, bin_ref, wblk_ref,
                            bblk_ref, wout_ref, bout_ref, o_ref, *,
                            nbaselayer, mm_dtype):
    adj = adj_ref[...]                       # already mm_dtype (bf16 by default)

    def layer(x, wcat, bias, relu):
        # One MXU pass over x; wcat = [W_neigh | W_self] with BN scale folded in.
        s = jnp.dot(x.astype(mm_dtype), wcat, preferred_element_type=jnp.float32)
        fout = wcat.shape[1] // 2
        s_neigh = s[:, :fout].astype(mm_dtype)   # 128-lane aligned static slice
        s_self = s[:, fout:]
        out = jnp.dot(adj, s_neigh, preferred_element_type=jnp.float32)
        out = out + s_self + bias                # folded BN/bias epilogue (VPU)
        return jnp.maximum(out, 0.0) if relu else out

    # Input layer: nfeat -> nhid, ReLU (dropout is identity in eval mode).
    x = layer(x_ref[...], win_ref[...], bin_ref[...], True)

    # Mid block: MultiLayerHGNN, dense=False, aggrmethod='add' -> x + block_input.
    x_blk_in = x
    for l in range(nbaselayer):
        x = layer(x, wblk_ref[l], bblk_ref[l], True)
    x = x + x_blk_in

    # Output layer: nhid -> nclass, identity activation.
    o_ref[...] = layer(x, wout_ref[...], bout_ref[...], False)


# ----------------------------------------------------------------------------
# Row-tiled fallback (adj too large for VMEM): per-layer support + aggregate.
# ----------------------------------------------------------------------------
def _support_kernel(x_ref, wcat_ref, b_ref, sneigh_ref, sself_ref, *, mm_dtype):
    s = jnp.dot(x_ref[...].astype(mm_dtype), wcat_ref[...],
                preferred_element_type=jnp.float32)
    fout = wcat_ref.shape[1] // 2
    sneigh_ref[...] = s[:, :fout].astype(sneigh_ref.dtype)
    sself_ref[...] = s[:, fout:] + b_ref[...]


def _aggregate_kernel(adj_ref, sneigh_ref, sself_ref, o_ref, *, relu):
    out = jnp.dot(adj_ref[...], sneigh_ref[...], preferred_element_type=jnp.float32)
    out = out + sself_ref[...]
    if relu:
        out = jnp.maximum(out, 0.0)
    o_ref[...] = out


def _layer_tiled(x, adj_mm, wcat, bias, relu, *, row_tile, mm_dtype, vmem_limit):
    n = x.shape[0]
    fout_pad = wcat.shape[1] // 2
    vmem = pl.BlockSpec(memory_space=pltpu.MemorySpace.VMEM)

    # support: s = x @ [W | W_self]  (x, weights fully resident; single MXU pass)
    sneigh, sself = pl.pallas_call(
        functools.partial(_support_kernel, mm_dtype=mm_dtype),
        out_shape=(jax.ShapeDtypeStruct((n, fout_pad), mm_dtype),
                   jax.ShapeDtypeStruct((n, fout_pad), jnp.float32)),
        in_specs=[vmem, vmem, vmem],
        out_specs=(vmem, vmem),
        compiler_params=pltpu.CompilerParams(vmem_limit_bytes=vmem_limit),
    )(x, wcat, bias)

    # aggregate: out[tile] = adj[tile, :] @ sneigh + sself[tile]; adj streamed
    # in row tiles, 'parallel' grid so v7x can split tiles across TensorCores.
    out = pl.pallas_call(
        functools.partial(_aggregate_kernel, relu=relu),
        out_shape=jax.ShapeDtypeStruct((n, fout_pad), jnp.float32),
        grid_spec=pltpu.PrefetchScalarGridSpec(
            num_scalar_prefetch=0,
            grid=(n // row_tile,),
            in_specs=[pl.BlockSpec((row_tile, n), lambda i: (i, 0)),
                      vmem,
                      pl.BlockSpec((row_tile, fout_pad), lambda i: (i, 0))],
            out_specs=pl.BlockSpec((row_tile, fout_pad), lambda i: (i, 0)),
        ),
        compiler_params=pltpu.CompilerParams(
            dimension_semantics=("parallel",),
            vmem_limit_bytes=vmem_limit),
    )(adj_mm, sneigh, sself)
    return out


# ----------------------------------------------------------------------------
# Parameter init (mirrors DeepGCN reset_parameters: U(-stdv, stdv)).
# ----------------------------------------------------------------------------
def _init_layer(key, fin, fout):
    kw, ks, kb = jax.random.split(key, 3)
    stdv = 1.0 / math.sqrt(fout)
    w = jax.random.uniform(kw, (fin, fout), jnp.float32, -stdv, stdv)
    wself = jax.random.uniform(ks, (fin, fout), jnp.float32, -stdv, stdv)
    b = jax.random.uniform(kb, (fout,), jnp.float32, -stdv, stdv)
    # BatchNorm1d(fout), eval mode with init stats (gamma=1, beta=0, mean=0, var=1).
    # TODO(synk): for a trained checkpoint, load the real running_mean / running_var.
    return dict(
        w=w, wself=wself, b=b,
        gamma=jnp.ones((fout,), jnp.float32),
        beta=jnp.zeros((fout,), jnp.float32),
        running_mean=jnp.zeros((fout,), jnp.float32),
        running_var=jnp.ones((fout,), jnp.float32),
    )


def init_gcn_model(key, nfeat, nhid, nclass, nbaselayer):
    keys = jax.random.split(key, 2 + nbaselayer)
    return {
        "ingc": _init_layer(keys[0], nfeat, nhid),
        "block": [_init_layer(keys[1 + i], nhid, nhid) for i in range(nbaselayer)],
        "outgc": _init_layer(keys[1 + nbaselayer], nhid, nclass),
    }


# ----------------------------------------------------------------------------
# Offline folding + lane padding.
#   BN eval:  y = gamma*(z - mean)/sqrt(var+eps) + beta  ->  scale*z + shift
#   Folded:   W' = W*scale, Wself' = Wself*scale, bias' = scale*b + shift
#   Packed:   Wcat = [W' | Wself'] padded to (fin_pad, 2*fout_pad), cast to mm_dtype.
# ----------------------------------------------------------------------------
def _fold_layer(p, fin_pad, fout_pad, mm_dtype):
    scale = p["gamma"] / jnp.sqrt(p["running_var"] + BN_EPS)          # (fout,)
    shift = p["beta"] - scale * p["running_mean"]
    w_eff = p["w"] * scale[None, :]
    wself_eff = p["wself"] * scale[None, :]
    bias_eff = scale * p["b"] + shift
    fin, fout = p["w"].shape
    wcat = jnp.zeros((fin_pad, 2 * fout_pad), jnp.float32)
    wcat = wcat.at[:fin, :fout].set(w_eff)
    wcat = wcat.at[:fin, fout_pad:fout_pad + fout].set(wself_eff)
    bias = jnp.zeros((1, fout_pad), jnp.float32).at[0, :fout].set(bias_eff)
    return wcat.astype(mm_dtype), bias                                # bias stays f32


def fold_and_pad_params(params, mm_dtype):
    nfeat, nhid = params["ingc"]["w"].shape
    nclass = params["outgc"]["w"].shape[1]
    f_pad = _round_up(nfeat, LANE)
    h_pad = _round_up(nhid, LANE)
    c_pad = _round_up(nclass, LANE)

    win, bin_ = _fold_layer(params["ingc"], f_pad, h_pad, mm_dtype)
    blk = [_fold_layer(p, h_pad, h_pad, mm_dtype) for p in params["block"]]
    wblk = jnp.stack([w for w, _ in blk])        # (L, h_pad, 2*h_pad)
    bblk = jnp.stack([b for _, b in blk])        # (L, 1, h_pad)
    wout, bout = _fold_layer(params["outgc"], h_pad, c_pad, mm_dtype)

    dims = dict(nfeat=nfeat, nhid=nhid, nclass=nclass,
                f_pad=f_pad, h_pad=h_pad, c_pad=c_pad)
    return (win, bin_, wblk, bblk, wout, bout), dims


# ----------------------------------------------------------------------------
# GCNModel.forward
# ----------------------------------------------------------------------------
def gcn_model_forward(params, fea, adj, *, use_bf16_matmul=True,
                      force_tiled=False, row_tile=None):
    n, nfeat = fea.shape
    assert adj.shape == (n, n)
    assert n % 8 == 0, "node count must be a multiple of 8 (sublane alignment)"

    mm_dtype = jnp.bfloat16 if use_bf16_matmul else jnp.float32
    mm_bytes = 2 if use_bf16_matmul else 4

    (win, bin_, wblk, bblk, wout, bout), dims = fold_and_pad_params(params, mm_dtype)
    assert dims["nfeat"] == nfeat
    f_pad, h_pad, c_pad = dims["f_pad"], dims["h_pad"], dims["c_pad"]
    nbaselayer = int(wblk.shape[0])

    # Cast outside the kernel: halves adj/x DMA + VMEM in bf16 mode and avoids a
    # duplicate f32+bf16 adj copy on chip.
    x_pad = jnp.zeros((n, f_pad), mm_dtype).at[:, :nfeat].set(fea.astype(mm_dtype))
    adj_mm = adj.astype(mm_dtype)

    vmem_cap = _vmem_capacity_bytes()

    # Whole-model working set of the fused path: inputs (single-buffered) + output
    # + in-kernel temporaries (per-layer s (N,2*H) f32, activations, residual, casts).
    w_elems = f_pad * 2 * h_pad + nbaselayer * h_pad * 2 * h_pad + h_pad * 2 * c_pad
    b_elems = (1 + nbaselayer) * h_pad + c_pad
    temps = (n * 2 * h_pad * 4 + 4 * n * max(h_pad, c_pad) * 4
             + n * max(f_pad, h_pad) * mm_bytes)
    fused_need = ((n * n + n * f_pad + w_elems) * mm_bytes
                  + b_elems * 4 + n * c_pad * 4 + temps)

    use_fused = (not force_tiled) and fused_need <= vmem_cap - (16 << 20)

    if use_fused:
        vmem_limit = int(min(vmem_cap - (8 << 20), max(2 * fused_need, 32 << 20)))
        vmem = pl.BlockSpec(memory_space=pltpu.MemorySpace.VMEM)
        args = (x_pad, adj_mm, win, bin_, wblk, bblk, wout, bout)
        kernel = functools.partial(_fused_gcn_model_kernel,
                                   nbaselayer=nbaselayer, mm_dtype=mm_dtype)
        out_pad = pl.pallas_call(
            kernel,
            out_shape=jax.ShapeDtypeStruct((n, c_pad), jnp.float32),
            in_specs=[vmem] * len(args),
            out_specs=vmem,
            compiler_params=pltpu.CompilerParams(vmem_limit_bytes=vmem_limit),
        )(*args)
    else:
        # Streaming fallback for large graphs (e.g. v7x's 64 MiB VMEM): weights and
        # activations resident, adj streamed in row tiles layer by layer.
        if row_tile is None:
            row_tile = next(t for t in (512, 256, 128, 64, 32, 16, 8) if n % t == 0)
        assert n % row_tile == 0 and row_tile % 8 == 0
        fin_max = max(f_pad, h_pad)
        fout_max = max(h_pad, c_pad)
        support_need = ((n * fin_max + fin_max * 2 * fout_max) * mm_bytes
                        + n * fout_max * (mm_bytes + 4) + n * 2 * fout_max * 4)
        agg_need = (2 * row_tile * n * mm_bytes + n * fout_max * mm_bytes
                    + 4 * row_tile * fout_max * 4 + row_tile * fout_max * 4)
        vmem_limit = int(min(vmem_cap - (8 << 20),
                             max(2 * max(support_need, agg_need), 32 << 20)))
        run = functools.partial(_layer_tiled, row_tile=row_tile,
                                mm_dtype=mm_dtype, vmem_limit=vmem_limit)
        x = run(x_pad, adj_mm, win, bin_, True)
        x_blk_in = x
        for l in range(nbaselayer):
            x = run(x.astype(mm_dtype), adj_mm, wblk[l], bblk[l], True)
        x = x + x_blk_in
        out_pad = run(x.astype(mm_dtype), adj_mm, wout, bout, False)

    return out_pad[:, :dims["nclass"]]


# ----------------------------------------------------------------------------
# Pure-JAX reference (unpadded, unfused, f32) for correctness checking.
# ----------------------------------------------------------------------------
def gcn_model_reference(params, fea, adj):
    def layer(x, p, relu):
        scale = p["gamma"] / jnp.sqrt(p["running_var"] + BN_EPS)
        shift = p["beta"] - scale * p["running_mean"]
        z = adj @ (x @ p["w"]) + x @ p["wself"] + p["b"]
        z = z * scale + shift
        return jnp.maximum(z, 0.0) if relu else z

    x = layer(fea, params["ingc"], True)
    x_in = x
    for p in params["block"]:
        x = layer(x, p, True)
    x = x + x_in
    return layer(x, params["outgc"], False)


# ----------------------------------------------------------------------------
# Driver
# ----------------------------------------------------------------------------
def _make_normalized_adj(key, n):
    # random symmetric graph + self loops, D^-1/2 (A + I) D^-1/2
    a = (jax.random.uniform(key, (n, n)) < 0.15).astype(jnp.float32)
    a = jnp.maximum(a, a.T)
    a = a + jnp.eye(n, dtype=jnp.float32)
    deg = jnp.sum(a, axis=1)
    d_inv_sqrt = 1.0 / jnp.sqrt(deg)
    return a * d_inv_sqrt[:, None] * d_inv_sqrt[None, :]


if __name__ == "__main__":
    N, NFEAT, NHID, NCLASS, NBASELAYER = 64, 16, 32, 8, 2

    root = jax.random.PRNGKey(0)
    k_fea, k_adj, k_par = jax.random.split(root, 3)

    fea = jax.random.normal(k_fea, (N, NFEAT), jnp.float32)
    adj = _make_normalized_adj(k_adj, N)
    params = init_gcn_model(k_par, NFEAT, NHID, NCLASS, NBASELAYER)

    ref = gcn_model_reference(params, fea, adj)
    tol_bf16 = 0.05 * (1.0 + float(jnp.max(jnp.abs(ref))))   # precision-aware bound

    # 1) exact f32 fused path (tight parity check with the PyTorch-equivalent math)
    out_f32 = jax.block_until_ready(
        gcn_model_forward(params, fea, adj, use_bf16_matmul=False))
    assert out_f32.shape == (N, NCLASS), out_f32.shape
    err = float(jnp.max(jnp.abs(out_f32 - ref)))
    assert err < 1e-4, f"f32 fused mismatch vs reference: {err}"

    # 2) default bf16 fused path (MXU-native matmuls, f32 accumulation)
    out_bf16 = jax.block_until_ready(gcn_model_forward(params, fea, adj))
    assert out_bf16.shape == (N, NCLASS)
    assert bool(jnp.all(jnp.isfinite(out_bf16)))
    err = float(jnp.max(jnp.abs(out_bf16 - ref)))
    assert err < tol_bf16, f"bf16 fused mismatch vs reference: {err} (tol {tol_bf16})"

    # 3) row-tiled streaming fallback (forced here so it is exercised at small N)
    out_tiled = jax.block_until_ready(
        gcn_model_forward(params, fea, adj, force_tiled=True, row_tile=32))
    err = float(jnp.max(jnp.abs(out_tiled - ref)))
    assert err < tol_bf16, f"tiled mismatch vs reference: {err} (tol {tol_bf16})"

    print("KERNEL_OK")
</pallas_src>

<mosaic_0001>
module attributes {stable_mosaic.version = 11 : i64} {
  func.func @_fused_gcn_model_kernel(%arg0: memref<64x128xf32, #tpu.memory_space<vmem>>, %arg1: memref<64x64xf32, #tpu.memory_space<vmem>>, %arg2: memref<128x256xf32, #tpu.memory_space<vmem>>, %arg3: memref<1x128xf32, #tpu.memory_space<vmem>>, %arg4: memref<2x128x256xf32, #tpu.memory_space<vmem>>, %arg5: memref<2x1x128xf32, #tpu.memory_space<vmem>>, %arg6: memref<128x256xf32, #tpu.memory_space<vmem>>, %arg7: memref<1x128xf32, #tpu.memory_space<vmem>>, %arg8: memref<64x128xf32, #tpu.memory_space<vmem>>) attributes {dimension_semantics = [], scalar_prefetch = 0 : i64, scratch_operands = 0 : i64, tpu.core_type = #tpu.core_type<tc>} {
    %c0 = arith.constant 0 : index
    %c0_0 = arith.constant 0 : index
    %0 = vector.load %arg1[%c0, %c0_0] : memref<64x64xf32, #tpu.memory_space<vmem>>, vector<64x64xf32>
    %c0_1 = arith.constant 0 : index
    %c0_2 = arith.constant 0 : index
    %1 = vector.load %arg0[%c0_1, %c0_2] : memref<64x128xf32, #tpu.memory_space<vmem>>, vector<64x128xf32>
    %c0_3 = arith.constant 0 : index
    %c0_4 = arith.constant 0 : index
    %2 = vector.load %arg2[%c0_3, %c0_4] : memref<128x256xf32, #tpu.memory_space<vmem>>, vector<128x256xf32>
    %c0_5 = arith.constant 0 : index
    %c0_6 = arith.constant 0 : index
    %3 = vector.load %arg3[%c0_5, %c0_6] : memref<1x128xf32, #tpu.memory_space<vmem>>, vector<1x128xf32>
    %cst = arith.constant dense<0.000000e+00> : vector<64x256xf32>
    %4 = tpu.matmul %1, %2, %cst {dimension_numbers = #tpu.dot_dimension_numbers<[1], [0], [0], [1], [0, 0, 1, 1], [], []>} : vector<64x128xf32>, vector<128x256xf32>, vector<64x256xf32> -> vector<64x256xf32>
    %5 = vector.extract_strided_slice %4 {offsets = [0, 0], sizes = [64, 128], strides = [1, 1]} : vector<64x256xf32> to vector<64x128xf32>
    %6 = vector.extract_strided_slice %4 {offsets = [0, 128], sizes = [64, 128], strides = [1, 1]} : vector<64x256xf32> to vector<64x128xf32>
    %cst_7 = arith.constant dense<0.000000e+00> : vector<64x128xf32>
    %7 = tpu.matmul %0, %5, %cst_7 {dimension_numbers = #tpu.dot_dimension_numbers<[1], [0], [0], [1], [0, 0, 1, 1], [], []>} : vector<64x64xf32>, vector<64x128xf32>, vector<64x128xf32> -> vector<64x128xf32>
    %8 = arith.addf %7, %6 : vector<64x128xf32>
    %9 = vector.broadcast %3 : vector<1x128xf32> to vector<64x128xf32>
    %10 = arith.addf %8, %9 : vector<64x128xf32>
    %cst_8 = arith.constant 0.000000e+00 : f32
    %11 = vector.broadcast %cst_8 : f32 to vector<64x128xf32>
    %12 = arith.maximumf %10, %11 : vector<64x128xf32>
    %c0_9 = arith.constant 0 : index
    %c0_10 = arith.constant 0 : index
    %c0_11 = arith.constant 0 : index
    %13 = vector.load %arg4[%c0_9, %c0_10, %c0_11] : memref<2x128x256xf32, #tpu.memory_space<vmem>>, vector<1x128x256xf32>
    %14 = vector.shape_cast %13 : vector<1x128x256xf32> to vector<128x256xf32>
    %c0_12 = arith.constant 0 : index
    %c0_13 = arith.constant 0 : index
    %c0_14 = arith.constant 0 : index
    %15 = vector.load %arg5[%c0_12, %c0_13, %c0_14] : memref<2x1x128xf32, #tpu.memory_space<vmem>>, vector<1x1x128xf32>
    %16 = vector.shape_cast %15 : vector<1x1x128xf32> to vector<1x128xf32>
    %cst_15 = arith.constant dense<0.000000e+00> : vector<64x256xf32>
    %17 = tpu.matmul %12, %14, %cst_15 {dimension_numbers = #tpu.dot_dimension_numbers<[1], [0], [0], [1], [0, 0, 1, 1], [], []>} : vector<64x128xf32>, vector<128x256xf32>, vector<64x256xf32> -> vector<64x256xf32>
    %18 = vector.extract_strided_slice %17 {offsets = [0, 0], sizes = [64, 128], strides = [1, 1]} : vector<64x256xf32> to vector<64x128xf32>
    %19 = vector.extract_strided_slice %17 {offsets = [0, 128], sizes = [64, 128], strides = [1, 1]} : vector<64x256xf32> to vector<64x128xf32>
    %cst_16 = arith.constant dense<0.000000e+00> : vector<64x128xf32>
    %20 = tpu.matmul %0, %18, %cst_16 {dimension_numbers = #tpu.dot_dimension_numbers<[1], [0], [0], [1], [0, 0, 1, 1], [], []>} : vector<64x64xf32>, vector<64x128xf32>, vector<64x128xf32> -> vector<64x128xf32>
    %21 = arith.addf %20, %19 : vector<64x128xf32>
    %22 = vector.broadcast %16 : vector<1x128xf32> to vector<64x128xf32>
    %23 = arith.addf %21, %22 : vector<64x128xf32>
    %cst_17 = arith.constant 0.000000e+00 : f32
    %24 = vector.broadcast %cst_17 : f32 to vector<64x128xf32>
    %25 = arith.maximumf %23, %24 : vector<64x128xf32>
    %c1 = arith.constant 1 : index
    %c0_18 = arith.constant 0 : index
    %c0_19 = arith.constant 0 : index
    %26 = vector.load %arg4[%c1, %c0_18, %c0_19] : memref<2x128x256xf32, #tpu.memory_space<vmem>>, vector<1x128x256xf32>
    %27 = vector.shape_cast %26 : vector<1x128x256xf32> to vector<128x256xf32>
    %c1_20 = arith.constant 1 : index
    %c0_21 = arith.constant 0 : index
    %c0_22 = arith.constant 0 : index
    %28 = vector.load %arg5[%c1_20, %c0_21, %c0_22] : memref<2x1x128xf32, #tpu.memory_space<vmem>>, vector<1x1x128xf32>
    %29 = vector.shape_cast %28 : vector<1x1x128xf32> to vector<1x128xf32>
    %cst_23 = arith.constant dense<0.000000e+00> : vector<64x256xf32>
    %30 = tpu.matmul %25, %27, %cst_23 {dimension_numbers = #tpu.dot_dimension_numbers<[1], [0], [0], [1], [0, 0, 1, 1], [], []>} : vector<64x128xf32>, vector<128x256xf32>, vector<64x256xf32> -> vector<64x256xf32>
    %31 = vector.extract_strided_slice %30 {offsets = [0, 0], sizes = [64, 128], strides = [1, 1]} : vector<64x256xf32> to vector<64x128xf32>
    %32 = vector.extract_strided_slice %30 {offsets = [0, 128], sizes = [64, 128], strides = [1, 1]} : vector<64x256xf32> to vector<64x128xf32>
    %cst_24 = arith.constant dense<0.000000e+00> : vector<64x128xf32>
    %33 = tpu.matmul %0, %31, %cst_24 {dimension_numbers = #tpu.dot_dimension_numbers<[1], [0], [0], [1], [0, 0, 1, 1], [], []>} : vector<64x64xf32>, vector<64x128xf32>, vector<64x128xf32> -> vector<64x128xf32>
    %34 = arith.addf %33, %32 : vector<64x128xf32>
    %35 = vector.broadcast %29 : vector<1x128xf32> to vector<64x128xf32>
    %36 = arith.addf %34, %35 : vector<64x128xf32>
    %cst_25 = arith.constant 0.000000e+00 : f32
    %37 = vector.broadcast %cst_25 : f32 to vector<64x128xf32>
    %38 = arith.maximumf %36, %37 : vector<64x128xf32>
    %39 = arith.addf %38, %12 : vector<64x128xf32>
    %c0_26 = arith.constant 0 : index
    %c0_27 = arith.constant 0 : index
    %40 = vector.load %arg6[%c0_26, %c0_27] : memref<128x256xf32, #tpu.memory_space<vmem>>, vector<128x256xf32>
    %c0_28 = arith.constant 0 : index
    %c0_29 = arith.constant 0 : index
    %41 = vector.load %arg7[%c0_28, %c0_29] : memref<1x128xf32, #tpu.memory_space<vmem>>, vector<1x128xf32>
    %cst_30 = arith.constant dense<0.000000e+00> : vector<64x256xf32>
    %42 = tpu.matmul %39, %40, %cst_30 {dimension_numbers = #tpu.dot_dimension_numbers<[1], [0], [0], [1], [0, 0, 1, 1], [], []>} : vector<64x128xf32>, vector<128x256xf32>, vector<64x256xf32> -> vector<64x256xf32>
    %43 = vector.extract_strided_slice %42 {offsets = [0, 0], sizes = [64, 128], strides = [1, 1]} : vector<64x256xf32> to vector<64x128xf32>
    %44 = vector.extract_strided_slice %42 {offsets = [0, 128], sizes = [64, 128], strides = [1, 1]} : vector<64x256xf32> to vector<64x128xf32>
    %cst_31 = arith.constant dense<0.000000e+00> : vector<64x128xf32>
    %45 = tpu.matmul %0, %43, %cst_31 {dimension_numbers = #tpu.dot_dimension_numbers<[1], [0], [0], [1], [0, 0, 1, 1], [], []>} : vector<64x64xf32>, vector<64x128xf32>, vector<64x128xf32> -> vector<64x128xf32>
    %46 = arith.addf %45, %44 : vector<64x128xf32>
    %47 = vector.broadcast %41 : vector<1x128xf32> to vector<64x128xf32>
    %48 = arith.addf %46, %47 : vector<64x128xf32>
    %c0_32 = arith.constant 0 : index
    %c0_33 = arith.constant 0 : index
    %49 = vector.load %arg8[%c0_32, %c0_33] : memref<64x128xf32, #tpu.memory_space<vmem>>, vector<64x128xf32>
    tpu.vector_store %arg8[%c0_32, %c0_33], %48 {strides = array<i32>} : memref<64x128xf32, #tpu.memory_space<vmem>>, vector<64x128xf32>,
    return
  }
}

</mosaic_0001>

<bundles_post_ra>
// kernel: tpu_custom_call.1
= control target key start
LH: loop header
LB: loop body
LE: loop exit
PB: predicated region body
PF: predicated region fallthrough
CT: control target
= control target key end

     0   :  { %13 = vsyncpa [#allocation3], 0  ;;  %s2190_s0 = inlined_call_operand.hbm [shape: f32[64,128], index: 0, kind: input, shape index: {}]   ;;  %s2191_s1 = inlined_call_operand.hbm [shape: f32[64,64], index: 1, kind: input, shape index: {}]   ;;  %s2192_s2 = inlined_call_operand.hbm [shape: f32[128,256], index: 2, kind: input, shape index: {}]   ;;  %s2193_s3 = inlined_call_operand.vmem [shape: f32[1,128], index: 3, kind: input, shape index: {}]   ;;  %s2194_s4 = inlined_call_operand.hbm [shape: f32[2,128,256], index: 4, kind: input, shape index: {}]   ;;  %s2195_s5 = inlined_call_operand.vmem [shape: f32[2,1,128], index: 5, kind: input, shape index: {}]   ;;  %s2196_s6 = inlined_call_operand.hbm [shape: f32[128,256], index: 6, kind: input, shape index: {}]   ;;  %s2197_s7 = inlined_call_operand.vmem [shape: f32[1,128], index: 7, kind: input, shape index: {}]   ;;  %s2198_s8 = inlined_call_operand.hbm [shape: f32[64,128], index: 8, kind: output, shape index: {}]  }
   0x1   :  { %14 = vsyncpa [#allocation6], 0 }
   0x2   :  { %15 = vsyncpa [#allocation9], 0 }
   0x3   :  { %16 = vsyncpa [#allocation4], 0  ;;  %s1816_s27 = smov [#allocation5]   ;;  %s1676_s9 = scalar_lea.hbm %s2191_s1, 1024 }
   0x4   :  { %s34_s28 = sshll.u32 %s1816_s27, 4  ;;  %p1677_p0 = scmp.ne.s32.totalorder %s2191_s1, %s1676_s9  ;;  %s35_s28 = int_to_ptr.vmem [resolvable:$true] %s34_s28 }
   0x5   :  { %p1680_p1 = scmp.lt.u32.totalorder %s1676_s9, %s2191_s1 }
   0x7   :  { %p1682_p2 = pnand %p1680_p1, %p1677_p0 }
   0x9   :  { %1685 = shalt.err (!%p1682_p2)
}
   0xa   :  { %s1686_s14 = scalar_lea.vmem %s35_s28, 1024  ;;  %p1691_p4 = scmp.lt.s32.totalorder %s35_s28, %s35_s28 }
   0xb   :  { %p1687_p3 = scmp.ne.s32.totalorder %s35_s28, %s1686_s14  ;;  %p1692_p5 = scmp.lt.s32.totalorder %s1686_s14, %s1686_s14 }
   0xd   :  { %p1693_p6 = por %p1692_p5, %p1691_p4 }
   0xf   :  { %p1694_p7 = pnand %p1693_p6, %p1687_p3 }
  0x11   :  { %1697 = shalt.err (!%p1694_p7)
}
  0x12   :  { %s1817_s15 = smov 128   ;;  %s1818_s16 = smov 8  }
  0x13   :  { %40 = dma.hbm_to_vmem [thread:$0]  %s2191_s1, 1024, %s35_s28, [#allocation6], %s1817_s15, %s1817_s15, %s1818_s16  }
  0x14   :  { %s1819_s19 = smov [#allocation8]   ;;  %s1820_s21 = smov [#allocation2]  }
  0x15   :  { %s60_s20 = sshll.u32 %s1819_s19, 4  ;;  %s22_s22 = sshll.u32 %s1820_s21, 4  ;;  %s61_s20 = int_to_ptr.vmem [resolvable:$true] %s60_s20  ;;  %s23_s22 = int_to_ptr.vmem [resolvable:$true] %s22_s22 }
  0x16   :  { %s1698_s25 = scalar_lea.hbm %s2194_s4, 8192 }
  0x17   :  { %p1699_p8 = scmp.ne.s32.totalorder %s2194_s4, %s1698_s25  ;;  %p1702_p9 = scmp.lt.u32.totalorder %s1698_s25, %s2194_s4 }
  0x19   :  { %p1704_p10 = pnand %p1702_p9, %p1699_p8 }
  0x1b   :  { %1707 = shalt.err (!%p1704_p10)
}
  0x1c   :  { %s1708_s1 = scalar_lea.vmem %s61_s20, 8192  ;;  %p1713_p12 = scmp.lt.s32.totalorder %s61_s20, %s61_s20 }
  0x1d   :  { %p1709_p11 = scmp.ne.s32.totalorder %s61_s20, %s1708_s1  ;;  %p1714_p13 = scmp.lt.s32.totalorder %s1708_s1, %s1708_s1 }
  0x1f   :  { %p1715_p0 = por %p1714_p13, %p1713_p12 }
  0x21   :  { %p1716_p1 = pnand %p1715_p0, %p1709_p11 }
  0x23   :  { %1719 = shalt.err (!%p1716_p1)
}
  0x24   :  { %s1821_s28 = smov 256   ;;  %s1822_s9 = smov 16  }
  0x25   :  { %66 = dma.hbm_to_vmem [thread:$0]  %s2194_s4, 8192, %s61_s20, [#allocation9], %s1821_s28, %s1821_s28, %s1822_s9  }
  0x26   :  { %s1720_s14 = scalar_lea.hbm %s2190_s0, 1024 }
  0x27   :  { %p1721_p2 = scmp.ne.s32.totalorder %s2190_s0, %s1720_s14  ;;  %p1724_p3 = scmp.lt.u32.totalorder %s1720_s14, %s2190_s0 }
  0x29   :  { %p1726_p4 = pnand %p1724_p3, %p1721_p2 }
  0x2b   :  { %1729 = shalt.err (!%p1726_p4)
}
  0x2c   :  { %s1730_s23 = scalar_lea.vmem %s23_s22, 1024  ;;  %p1735_p6 = scmp.lt.s32.totalorder %s23_s22, %s23_s22 }
  0x2d   :  { %p1731_p5 = scmp.ne.s32.totalorder %s23_s22, %s1730_s23  ;;  %p1736_p7 = scmp.lt.s32.totalorder %s1730_s23, %s1730_s23 }
  0x2f   :  { %p1737_p8 = por %p1736_p7, %p1735_p6 }
  0x31   :  { %p1738_p9 = pnand %p1737_p8, %p1731_p5 }
  0x33   :  { %1741 = shalt.err (!%p1738_p9)
}
  0x34   :  { %28 = dma.hbm_to_vmem [thread:$0]  %s2190_s0, 1024, %s23_s22, [#allocation3], %s1817_s15, %s1817_s15, %s1818_s16  }
  0x35   :  { %s1823_s24 = smov [#allocation7]   ;;  %s1824_s26 = smov [#allocation10]  }
  0x36   :  { %s46_s25 = sshll.u32 %s1823_s24, 4  ;;  %s74_s27 = sshll.u32 %s1824_s26, 4  ;;  %s47_s25 = int_to_ptr.vmem [resolvable:$true] %s46_s25  ;;  %s75_s27 = int_to_ptr.vmem [resolvable:$true] %s74_s27 }
  0x37   :  { %s1742_s1 = scalar_lea.hbm %s2192_s2, 4096 }
  0x38   :  { %p1743_p10 = scmp.ne.s32.totalorder %s2192_s2, %s1742_s1  ;;  %p1746_p11 = scmp.lt.u32.totalorder %s1742_s1, %s2192_s2 }
  0x3a   :  { %p1748_p12 = pnand %p1746_p11, %p1743_p10 }
  0x3c   :  { %1751 = shalt.err (!%p1748_p12)
}
  0x3d   :  { %s1752_s0 = scalar_lea.vmem %s47_s25, 4096  ;;  %p1757_p0 = scmp.lt.s32.totalorder %s47_s25, %s47_s25 }
  0x3e   :  { %p1753_p13 = scmp.ne.s32.totalorder %s47_s25, %s1752_s0  ;;  %p1758_p1 = scmp.lt.s32.totalorder %s1752_s0, %s1752_s0 }
  0x40   :  { %p1759_p2 = por %p1758_p1, %p1757_p0 }
  0x42   :  { %p1760_p3 = pnand %p1759_p2, %p1753_p13 }
  0x44   :  { %1763 = shalt.err (!%p1760_p3)
}
  0x45   :  { %52 = dma.hbm_to_vmem [thread:$0]  %s2192_s2, 4096, %s47_s25, [#allocation6], %s1821_s28, %s1821_s28, %s1822_s9  }
  0x46   :  { %s1764_s19 = scalar_lea.hbm %s2196_s6, 4096 }
  0x47   :  { %p1765_p4 = scmp.ne.s32.totalorder %s2196_s6, %s1764_s19  ;;  %p1768_p5 = scmp.lt.u32.totalorder %s1764_s19, %s2196_s6 }
  0x49   :  { %p1770_p6 = pnand %p1768_p5, %p1765_p4 }
  0x4b   :  { %1773 = shalt.err (!%p1770_p6)
}
  0x4c   :  { %s1774_s24 = scalar_lea.vmem %s75_s27, 4096  ;;  %p1779_p8 = scmp.lt.s32.totalorder %s75_s27, %s75_s27 }
  0x4d   :  { %p1775_p7 = scmp.ne.s32.totalorder %s75_s27, %s1774_s24  ;;  %p1780_p9 = scmp.lt.s32.totalorder %s1774_s24, %s1774_s24 }
  0x4f   :  { %p1781_p10 = por %p1780_p9, %p1779_p8 }
  0x51   :  { %p1782_p11 = pnand %p1781_p10, %p1775_p7 }
  0x53   :  { %1785 = shalt.err (!%p1782_p11)
}
  0x54   :  { %80 = dma.hbm_to_vmem [thread:$0]  %s2196_s6, 4096, %s75_s27, [#allocation9], %s1821_s28, %s1821_s28, %s1822_s9  }
  0x55   :  { %1808 = dma.done.wait [#allocation3], 1024  }
  0x56   :  { %1809 = vsyncadd [#allocation3], 4294966272 }
  0x57   :  { %1810 = dma.done.wait [#allocation6], 5120  }
  0x58   :  { %1811 = vsyncadd [#allocation6], 4294962176 }
  0x59   :  { %1812 = dma.done.wait [#allocation9], 12288  }
  0x5a   :  { %1813 = vsyncadd [#allocation9], 4294955008  ;;  %v1825_v0 = vmov 0.0   ;;  %v115_v1 = vld [vmem:[#allocation7 + $0x8] sm:$0xff]  ;;  %v117_v2 = vld [vmem:[#allocation7 + $0x18] sm:$0xff]  ;;  %vm260_vm0 = vcmask 523264  }
  0x5b   :  { %211 = vmatprep.mubr.f32.mxu0 %v1825_v0  ;;  %v114_v3 = vld [vmem:[#allocation7] sm:$0xff]  ;;  %v1473_v4 = vpack.c.bf16 %v117_v2, %v115_v1  ;;  %v116_v5 = vld [vmem:[#allocation7 + $0x10] sm:$0xff]  ;;  %v119_v6 = vld [vmem:[#allocation7 + $0x28] sm:$0xff] }
  0x5c   :  { %v121_v7 = vld [vmem:[#allocation7 + $0x38] sm:$0xff]  ;;  %v1475_v8 = vpack.c.bf16 %v116_v5, %v114_v3  ;;  %v118_v10 = vld [vmem:[#allocation7 + $0x20] sm:$0xff]  ;;  %v120_v11 = vld [vmem:[#allocation7 + $0x30] sm:$0xff] }
  0x5d   :  { %v1477_v9 = vpack.c.bf16 %v121_v7, %v119_v6  ;;  %v123_v12 = vld [vmem:[#allocation7 + $0x48] sm:$0xff]  ;;  %1474 = vmatprep.subr.bf16.mxu0 %v1473_v4  ;;  %v125_v13 = vld [vmem:[#allocation7 + $0x58] sm:$0xff]  ;;  %v1479_v14 = vpack.c.bf16 %v120_v11, %v118_v10  ;;  %v122_v16 = vld [vmem:[#allocation7 + $0x40] sm:$0xff] }
  0x5e   :  { %1476 = vmatpush1.bf16.msra.mxu0 %v1475_v8  ;;  %v1481_v15 = vpack.c.bf16 %v125_v13, %v123_v12  ;;  %v124_v17 = vld [vmem:[#allocation7 + $0x50] sm:$0xff]  ;;  %v127_v18 = vld [vmem:[#allocation7 + $0x68] sm:$0xff]  ;;  %v129_v19 = vld [vmem:[#allocation7 + $0x78] sm:$0xff] }
  0x5f   :  { %1478 = vmatprep.subr.bf16.mxu0 %v1477_v9  ;;  %v1483_v20 = vpack.c.bf16 %v124_v17, %v122_v16  ;;  %v1485_v21 = vpack.c.bf16 %v129_v19, %v127_v18  ;;  %v126_v22 = vld [vmem:[#allocation7 + $0x60] sm:$0xff]  ;;  %v128_v23 = vld [vmem:[#allocation7 + $0x70] sm:$0xff]  ;;  %v131_v24 = vld [vmem:[#allocation7 + $0x88] sm:$0xff] }
  0x60   :  { %v133_v25 = vld [vmem:[#allocation7 + $0x98] sm:$0xff]  ;;  %v1487_v26 = vpack.c.bf16 %v128_v23, %v126_v22  ;;  %v130_v28 = vld [vmem:[#allocation7 + $0x80] sm:$0xff]  ;;  %v132_v29 = vld [vmem:[#allocation7 + $0x90] sm:$0xff] }
  0x61   :  { %v1489_v27 = vpack.c.bf16 %v133_v25, %v131_v24  ;;  %v135_v30 = vld [vmem:[#allocation7 + $0xa8] sm:$0xff]  ;;  %v137_v31 = vld [vmem:[#allocation7 + $0xb8] sm:$0xff]  ;;  %v1491_v32 = vpack.c.bf16 %v132_v29, %v130_v28  ;;  %v134_v34 = vld [vmem:[#allocation7 + $0xa0] sm:$0xff] }
  0x62   :  { %1480 = vmatpush1.bf16.msra.mxu0 %v1479_v14  ;;  %v1493_v33 = vpack.c.bf16 %v137_v31, %v135_v30  ;;  %v136_v35 = vld [vmem:[#allocation7 + $0xb0] sm:$0xff]  ;;  %v139_v36 = vld [vmem:[#allocation7 + $0xc8] sm:$0xff]  ;;  %v141_v37 = vld [vmem:[#allocation7 + $0xd8] sm:$0xff] }
  0x63   :  { %1482 = vmatprep.subr.bf16.mxu0 %v1481_v15  ;;  %v1495_v38 = vpack.c.bf16 %v136_v35, %v134_v34  ;;  %v1497_v39 = vpack.c.bf16 %v141_v37, %v139_v36  ;;  %v138_v40 = vld [vmem:[#allocation7 + $0xc0] sm:$0xff]  ;;  %v140_v41 = vld [vmem:[#allocation7 + $0xd0] sm:$0xff]  ;;  %v143_v42 = vld [vmem:[#allocation7 + $0xe8] sm:$0xff] }
  0x64   :  { %v145_v43 = vld [vmem:[#allocation7 + $0xf8] sm:$0xff]  ;;  %v1499_v44 = vpack.c.bf16 %v140_v41, %v138_v40  ;;  %v142_v46 = vld [vmem:[#allocation7 + $0xe0] sm:$0xff]  ;;  %v144_v47 = vld [vmem:[#allocation7 + $0xf0] sm:$0xff] }
  0x65   :  { %v1501_v45 = vpack.c.bf16 %v145_v43, %v143_v42  ;;  %v1503_v48 = vpack.c.bf16 %v144_v47, %v142_v46  ;;  %v106_v49 = vld [vmem:[#allocation2] sm:$0xff]  ;;  %v107_v50 = vld [vmem:[#allocation2 + $0x8] sm:$0xff]  ;;  %v108_v51 = vld [vmem:[#allocation2 + $0x10] sm:$0xff] }
  0x66   :  { %1484 = vmatpush1.bf16.msra.mxu0 %v1483_v20  ;;  %v109_v52 = vld [vmem:[#allocation2 + $0x18] sm:$0xff]  ;;  %v110_v53 = vld [vmem:[#allocation2 + $0x20] sm:$0xff]  ;;  %v111_v54 = vld [vmem:[#allocation2 + $0x28] sm:$0xff] }
  0x67   :  { %1486 = vmatprep.subr.bf16.mxu0 %v1485_v21  ;;  %v112_v55 = vld [vmem:[#allocation2 + $0x30] sm:$0xff]  ;;  %v113_v56 = vld [vmem:[#allocation2 + $0x38] sm:$0xff]  ;;  %v1955_v57 = vld [vmem:[#allocation5] sm:$0xff] }
  0x68   :  { %1377 = vmatprep.mubr.msk.f32.mxu1 %vm260_vm0, %v1955_v57  ;;  %v413_v12 = vld [vmem:[#allocation8 + $0x8] sm:$0xff]  ;;  %v415_v13 = vld [vmem:[#allocation8 + $0x18] sm:$0xff]  ;;  %v412_v18 = vld [vmem:[#allocation8] sm:$0xff] }
  0x69   :  { %v1521_v17 = vpack.c.bf16 %v415_v13, %v413_v12  ;;  %v414_v19 = vld [vmem:[#allocation8 + $0x10] sm:$0xff]  ;;  %v417_v20 = vld [vmem:[#allocation8 + $0x28] sm:$0xff]  ;;  %v419_v21 = vld [vmem:[#allocation8 + $0x38] sm:$0xff] }
  0x6a   :  { %1488 = vmatpush1.bf16.msra.mxu0 %v1487_v26  ;;  %v1977_v22 = vld [vmem:[#allocation5 + $0x8] sm:$0xff]  ;;  %v1523_v23 = vpack.c.bf16 %v414_v19, %v412_v18  ;;  %v1979_v24 = vld [vmem:[#allocation5 + $0x10] sm:$0xff]  ;;  %v1525_v25 = vpack.c.bf16 %v419_v21, %v417_v20  ;;  %v416_v26 = vld [vmem:[#allocation8 + $0x20] sm:$0xff] }
  0x6b   :  { %1490 = vmatprep.subr.bf16.mxu0 %v1489_v27  ;;  %v418_v27 = vld [vmem:[#allocation8 + $0x30] sm:$0xff]  ;;  %v421_v28 = vld [vmem:[#allocation8 + $0x48] sm:$0xff]  ;;  %v423_v29 = vld [vmem:[#allocation8 + $0x58] sm:$0xff] }
  0x6c   :  { %v1985_v30 = vld [vmem:[#allocation5 + $0x18] sm:$0xff]  ;;  %v1527_v31 = vpack.c.bf16 %v418_v27, %v416_v26  ;;  %v420_v34 = vld [vmem:[#allocation8 + $0x40] sm:$0xff]  ;;  %v422_v35 = vld [vmem:[#allocation8 + $0x50] sm:$0xff] }
  0x6d   :  { %v425_v36 = vld [vmem:[#allocation8 + $0x68] sm:$0xff]  ;;  %v427_v37 = vld [vmem:[#allocation8 + $0x78] sm:$0xff]  ;;  %v1995_v40 = vld [vmem:[#allocation5 + $0x30] sm:$0xff] }
  0x6e   :  { %1492 = vmatpush1.bf16.msra.mxu0 %v1491_v32  ;;  %v1987_v32 = vld [vmem:[#allocation5 + $0x20] sm:$0xff]  ;;  %v1533_v41 = vpack.c.bf16 %v427_v37, %v425_v36  ;;  %v426_v43 = vld [vmem:[#allocation8 + $0x70] sm:$0xff]  ;;  %v2001_v46 = vld [vmem:[#allocation5 + $0x38] sm:$0xff] }
  0x6f   :  { %1494 = vmatprep.subr.bf16.mxu0 %v1493_v33  ;;  %v1529_v33 = vpack.c.bf16 %v423_v29, %v421_v28  ;;  %v424_v42 = vld [vmem:[#allocation8 + $0x60] sm:$0xff]  ;;  %v442_v13 = vld [vmem:[#allocation8 + $0xf0] sm:$0xff] }
  0x70   :  { %v1535_v47 = vpack.c.bf16 %v426_v43, %v424_v42  ;;  %v440_v12 = vld [vmem:[#allocation8 + $0xe0] sm:$0xff] }
  0x72   :  { %1496 = vmatpush1.bf16.msra.mxu0 %v1495_v38  ;;  %v1993_v38 = vld [vmem:[#allocation5 + $0x28] sm:$0xff] }
  0x73   :  { %1498 = vmatprep.subr.bf16.mxu0 %v1497_v39  ;;  %v1531_v39 = vpack.c.bf16 %v422_v35, %v420_v34 }
  0x76   :  { %1500 = vmatpush1.bf16.msra.mxu0 %v1499_v44  ;;  %v429_v44 = vld [vmem:[#allocation8 + $0x88] sm:$0xff] }
  0x77   :  { %1502 = vmatprep.subr.bf16.mxu0 %v1501_v45  ;;  %v431_v45 = vld [vmem:[#allocation8 + $0x98] sm:$0xff] }
  0x7a   :  { %1504 = vmatpush1.bf16.msra.mxu0 %v1503_v48  ;;  %v1537_v48 = vpack.c.bf16 %v431_v45, %v429_v44 }
  0x7d   :  { %212 = vmatmul.mubr.f32.vlgmr.msra.gmra.mrb[0].mxu0 %v106_v49  ;;  %v428_v49 = vld [vmem:[#allocation8 + $0x80] sm:$0xff] }
  0x7e   :  { %217 = vmatprep.mubr.f32.mxu0 %v1825_v0 }
  0x81   :  { %218 = vmatmul.mubr.f32.gmra.mrb[2].mxu0 %v107_v50  ;;  %v430_v50 = vld [vmem:[#allocation8 + $0x90] sm:$0xff] }
  0x82   :  { %223 = vmatprep.mubr.f32.mxu0 %v1825_v0 }
  0x85   :  { %224 = vmatmul.mubr.f32.gmra.mrb[4].mxu0 %v108_v51  ;;  %v433_v51 = vld [vmem:[#allocation8 + $0xa8] sm:$0xff] }
  0x86   :  { %229 = vmatprep.mubr.f32.mxu0 %v1825_v0 }
  0x89   :  { %230 = vmatmul.mubr.f32.gmra.mrb[6].mxu0 %v109_v52  ;;  %v435_v52 = vld [vmem:[#allocation8 + $0xb8] sm:$0xff] }
  0x8a   :  { %235 = vmatprep.mubr.f32.mxu0 %v1825_v0 }
  0x8d   :  { %236 = vmatmul.mubr.f32.gmra.mrb[8].mxu0 %v110_v53  ;;  %v1539_v53 = vpack.c.bf16 %v430_v50, %v428_v49  ;;  %v689_v49 = vld [vmem:[#allocation8 + $0x118] sm:$0xff]  ;;  %v686_v50 = vld [vmem:[#allocation8 + $0x100] sm:$0xff] }
  0x8e   :  { %241 = vmatprep.mubr.f32.mxu0 %v1825_v0 }
  0x91   :  { %242 = vmatmul.mubr.f32.gmra.mrb[10].mxu0 %v111_v54  ;;  %v1541_v54 = vpack.c.bf16 %v435_v52, %v433_v51  ;;  %v688_v52 = vld [vmem:[#allocation8 + $0x110] sm:$0xff] }
  0x92   :  { %247 = vmatprep.mubr.f32.mxu0 %v1825_v0 }
  0x95   :  { %248 = vmatmul.mubr.f32.gmra.mrb[12].mxu0 %v112_v55  ;;  %v432_v55 = vld [vmem:[#allocation8 + $0xa0] sm:$0xff] }
  0x96   :  { %253 = vmatprep.mubr.f32.mxu0 %v1825_v0 }
  0x99   :  { %254 = vmatmul.mubr.f32.gmra.mrb[14].mxu0 %v113_v56  ;;  %v434_v56 = vld [vmem:[#allocation8 + $0xb0] sm:$0xff] }
  0x9a   :  { %1405 = vmatprep.mubr.msk.f32.mxu0 %vm260_vm0, %v1955_v57 }
 0x150   :  { %v213_v58 = vpop.f32.mrb[0].mxu0 }
 0x151   :  { %v1961_v59 = vpop.f32.mrb[1].mxu0 }
 0x154   :  { %v219_v60 = vpop.f32.mrb[2].mxu0 }
 0x155   :  { %v1505_v61 = vpack.c.bf16 %v219_v60, %v213_v58  ;;  %v1963_v62 = vpop.f32.mrb[3].mxu0  ;;  %v1543_v58 = vpack.c.bf16 %v434_v56, %v432_v55  ;;  %v437_v60 = vld [vmem:[#allocation8 + $0xc8] sm:$0xff]  ;;  %v1571_v55 = vpack.c.bf16 %v688_v52, %v686_v50 }
 0x157   :  { %1506 = vmatprep.subr.bf16.mxu1 %v1505_v61 }
 0x158   :  { %v225_v63 = vpop.f32.mrb[4].mxu0  ;;  %1508 = vmatpush3.bf16.msra.mxu1 %v1505_v61  ;;  %v439_v61 = vld [vmem:[#allocation8 + $0xd8] sm:$0xff] }
 0x159   :  { %v1965_v1 = vpop.f32.mrb[5].mxu0 }
 0x15c   :  { %v231_v2 = vpop.f32.mrb[6].mxu0 }
 0x15d   :  { %v1509_v3 = vpack.c.bf16 %v231_v2, %v225_v63  ;;  %v1967_v4 = vpop.f32.mrb[7].mxu0  ;;  %v1545_v63 = vpack.c.bf16 %v439_v61, %v437_v60  ;;  %v436_v2 = vld [vmem:[#allocation8 + $0xc0] sm:$0xff]  ;;  %v692_v60 = vld [vmem:[#allocation8 + $0x130] sm:$0xff]  ;;  %v695_v61 = vld [vmem:[#allocation8 + $0x148] sm:$0xff] }
 0x15f   :  { %1510 = vmatprep.subr.bf16.mxu1 %v1509_v3 }
 0x160   :  { %v237_v5 = vpop.f32.mrb[8].mxu0  ;;  %1512 = vmatpush3.bf16.msra.mxu1 %v1509_v3  ;;  %v438_v3 = vld [vmem:[#allocation8 + $0xd0] sm:$0xff] }
 0x161   :  { %v1969_v6 = vpop.f32.mrb[9].mxu0 }
 0x164   :  { %v243_v7 = vpop.f32.mrb[10].mxu0 }
 0x165   :  { %v1513_v8 = vpack.c.bf16 %v243_v7, %v237_v5  ;;  %v1971_v9 = vpop.f32.mrb[11].mxu0  ;;  %v1547_v5 = vpack.c.bf16 %v438_v3, %v436_v2  ;;  %v441_v7 = vld [vmem:[#allocation8 + $0xe8] sm:$0xff] }
 0x167   :  { %1514 = vmatprep.subr.bf16.mxu1 %v1513_v8 }
 0x168   :  { %v249_v10 = vpop.f32.mrb[12].mxu0  ;;  %1516 = vmatpush3.bf16.msra.mxu1 %v1513_v8  ;;  %v443_v8 = vld [vmem:[#allocation8 + $0xf8] sm:$0xff] }
 0x169   :  { %v1973_v11 = vpop.f32.mrb[13].mxu0 }
 0x16c   :  { %v255_v14 = vpop.f32.mrb[14].mxu0 }
 0x16d   :  { %v1517_v15 = vpack.c.bf16 %v255_v14, %v249_v10  ;;  %v1975_v16 = vpop.f32.mrb[15].mxu0  ;;  %v1549_v10 = vpack.c.bf16 %v443_v8, %v441_v7  ;;  %v1551_v14 = vpack.c.bf16 %v442_v13, %v440_v12  ;;  %v696_v7 = vld [vmem:[#allocation8 + $0x150] sm:$0xff]  ;;  %v699_v8 = vld [vmem:[#allocation8 + $0x168] sm:$0xff] }
 0x16f   :  { %1518 = vmatprep.subr.bf16.mxu1 %v1517_v15 }
 0x170   :  { %1520 = vmatpush3.bf16.msra.mxu1 %v1517_v15 }
 0x171   :  { %1522 = vmatprep.subr.bf16.mxu1 %v1521_v17  ;;  %v1268_v17 = vld [vmem:[%s2193_s3] ss:$0 sm:$0xff] }
 0x173   :  { %1378 = vmatmul.mubr.msk.f32.vlgmr.msra.gmra.mrb[0].mxu1 %vm260_vm0, %v1977_v22 }
 0x174   :  { %1380 = vmatprep.mubr.msk.f32.mxu1 %vm260_vm0, %v1979_v24  ;;  %1524 = vmatpush1.bf16.msra.mxu1 %v1523_v23 }
 0x175   :  { %1526 = vmatprep.subr.bf16.mxu1 %v1525_v25 }
 0x177   :  { %1381 = vmatmul.mubr.msk.f32.gmra.mrb[2].mxu1 %vm260_vm0, %v1985_v30 }
 0x178   :  { %1383 = vmatprep.mubr.msk.f32.mxu1 %vm260_vm0, %v1987_v32  ;;  %1528 = vmatpush1.bf16.msra.mxu1 %v1527_v31 }
 0x179   :  { %1530 = vmatprep.subr.bf16.mxu1 %v1529_v33 }
 0x17b   :  { %1384 = vmatmul.mubr.msk.f32.gmra.mrb[4].mxu1 %vm260_vm0, %v1993_v38 }
 0x17c   :  { %1386 = vmatprep.mubr.msk.f32.mxu1 %vm260_vm0, %v1995_v40  ;;  %1532 = vmatpush1.bf16.msra.mxu1 %v1531_v39 }
 0x17d   :  { %1534 = vmatprep.subr.bf16.mxu1 %v1533_v41 }
 0x17f   :  { %1387 = vmatmul.mubr.msk.f32.gmra.mrb[6].mxu1 %vm260_vm0, %v2001_v46 }
 0x180   :  { %1536 = vmatpush1.bf16.msra.mxu1 %v1535_v47  ;;  %509 = vmatprep.mubr.f32.mxu1 %v1825_v0 }
 0x181   :  { %1538 = vmatprep.subr.bf16.mxu1 %v1537_v48  ;;  %v687_v48 = vld [vmem:[#allocation8 + $0x108] sm:$0xff] }
 0x182   :  { %v1569_v51 = vpack.c.bf16 %v689_v49, %v687_v48 }
 0x184   :  { %1540 = vmatpush1.bf16.msra.mxu1 %v1539_v53  ;;  %v691_v53 = vld [vmem:[#allocation8 + $0x128] sm:$0xff] }
 0x185   :  { %1542 = vmatprep.subr.bf16.mxu1 %v1541_v54  ;;  %v693_v54 = vld [vmem:[#allocation8 + $0x138] sm:$0xff] }
 0x186   :  { %v1573_v56 = vpack.c.bf16 %v693_v54, %v691_v53 }
 0x188   :  { %1544 = vmatpush1.bf16.msra.mxu1 %v1543_v58  ;;  %v690_v58 = vld [vmem:[#allocation8 + $0x120] sm:$0xff] }
 0x189   :  { %1546 = vmatprep.subr.bf16.mxu1 %v1545_v63  ;;  %v697_v63 = vld [vmem:[#allocation8 + $0x158] sm:$0xff]  ;;  %v1575_v2 = vpack.c.bf16 %v692_v60, %v690_v58 }
 0x18a   :  { %v1577_v3 = vpack.c.bf16 %v697_v63, %v695_v61 }
 0x18c   :  { %1548 = vmatpush1.bf16.msra.mxu1 %v1547_v5  ;;  %v694_v5 = vld [vmem:[#allocation8 + $0x140] sm:$0xff] }
 0x18d   :  { %1550 = vmatprep.subr.bf16.mxu1 %v1549_v10  ;;  %v701_v10 = vld [vmem:[#allocation8 + $0x178] sm:$0xff]  ;;  %v1579_v12 = vpack.c.bf16 %v696_v7, %v694_v5 }
 0x18e   :  { %v1581_v13 = vpack.c.bf16 %v701_v10, %v699_v8  ;;  %v711_v8 = vld [vmem:[#allocation8 + $0x1c8] sm:$0xff]  ;;  %v713_v10 = vld [vmem:[#allocation8 + $0x1d8] sm:$0xff] }
 0x190   :  { %1552 = vmatpush1.bf16.msra.mxu1 %v1551_v14  ;;  %v698_v14 = vld [vmem:[#allocation8 + $0x160] sm:$0xff] }
 0x191   :  { %1570 = vmatprep.subr.bf16.mxu1 %v1569_v51 }
 0x246   :  { %v1379_v15 = vpop.f32.mrb[0].mxu1 }
 0x247   :  { %v357_v18 = vadd.f32 %v1379_v15, %v1963_v62  ;;  %v351_v19 = vpop.f32.mrb[1].mxu1  ;;  %v700_v15 = vld [vmem:[#allocation8 + $0x170] sm:$0xff] }
 0x248   :  { %v352_v20 = vadd.f32 %v351_v19, %v1961_v59  ;;  %v1583_v19 = vpack.c.bf16 %v700_v15, %v698_v14  ;;  %v712_v14 = vld [vmem:[#allocation8 + $0x1d0] sm:$0xff] }
 0x249   :  { %v2014_v27 = vadd.f32 %v1268_v17, %v357_v18  ;;  %v705_v18 = vld [vmem:[#allocation8 + $0x198] sm:$0xff] }
 0x24a   :  { %v2011_v21 = vadd.f32 %v1268_v17, %v352_v20  ;;  %v1382_v23 = vpop.f32.mrb[2].mxu1 }
 0x24b   :  { %v367_v25 = vadd.f32 %v1382_v23, %v1967_v4  ;;  %v361_v26 = vpop.f32.mrb[3].mxu1  ;;  %v405_v59 = vmax.f32 %v2014_v27, 0.0  ;;  %v702_v23 = vld [vmem:[#allocation8 + $0x180] sm:$0xff] }
 0x24c   :  { %v404_v28 = vmax.f32 %v2011_v21, 0.0  ;;  %v362_v29 = vadd.f32 %v361_v26, %v1965_v1  ;;  %v707_v26 = vld [vmem:[#allocation8 + $0x1a8] sm:$0xff] }
 0x24d   :  { %v2030_v37 = vadd.f32 %v1268_v17, %v367_v25  ;;  %v704_v25 = vld [vmem:[#allocation8 + $0x190] sm:$0xff] }
 0x24e   :  { %v1385_v31 = vpop.f32.mrb[4].mxu1  ;;  %510 = vmatmul.mubr.f32.vlgmr.msra.gmra.mrb[8].mxu1 %v404_v28  ;;  %v2023_v34 = vadd.f32 %v1268_v17, %v362_v29  ;;  %v709_v29 = vld [vmem:[#allocation8 + $0x1b8] sm:$0xff] }
 0x24f   :  { %v377_v62 = vadd.f32 %v1385_v31, %v1971_v9  ;;  %v371_v33 = vpop.f32.mrb[5].mxu1  ;;  %515 = vmatprep.mubr.f32.mxu1 %v1825_v0  ;;  %1572 = vmatpush1.bf16.msra.mxu1 %v1571_v55  ;;  %v1587_v31 = vpack.c.bf16 %v704_v25, %v702_v23  ;;  %v716_v23 = vld [vmem:[#allocation8 + $0x1f0] sm:$0xff] }
 0x250   :  { %v372_v4 = vadd.f32 %v371_v33, %v1969_v6  ;;  %v406_v9 = vmax.f32 %v2023_v34, 0.0  ;;  %v407_v6 = vmax.f32 %v2030_v37, 0.0  ;;  %1574 = vmatprep.subr.bf16.mxu1 %v1573_v56  ;;  %v706_v33 = vld [vmem:[#allocation8 + $0x1a0] sm:$0xff] }
 0x252   :  { %v1388_v35 = vpop.f32.mrb[6].mxu1  ;;  %516 = vmatmul.mubr.f32.gmra.mrb[10].mxu1 %v405_v59  ;;  %v2038_v41 = vadd.f32 %v1268_v17, %v372_v4  ;;  %v708_v4 = vld [vmem:[#allocation8 + $0x1b0] sm:$0xff] }
 0x253   :  { %v387_v1 = vadd.f32 %v1388_v35, %v1975_v16  ;;  %v381_v36 = vpop.f32.mrb[7].mxu1  ;;  %521 = vmatprep.mubr.f32.mxu1 %v1825_v0  ;;  %v2043_v16 = vadd.f32 %v1268_v17, %v377_v62  ;;  %1576 = vmatpush1.bf16.msra.mxu1 %v1575_v2  ;;  %v1589_v62 = vpack.c.bf16 %v709_v29, %v707_v26  ;;  %v1277_v29 = vld [vmem:[%s2195_s5] ss:$0 sm:$0xff] }
 0x254   :  { %v382_v39 = vadd.f32 %v381_v36, %v1973_v11  ;;  %v408_v42 = vmax.f32 %v2038_v41, 0.0  ;;  %1578 = vmatprep.subr.bf16.mxu1 %v1577_v3  ;;  %v1591_v35 = vpack.c.bf16 %v708_v4, %v706_v33 }
 0x255   :  { %v409_v11 = vmax.f32 %v2043_v16, 0.0  ;;  %v2055_v44 = vadd.f32 %v1268_v17, %v387_v1 }
 0x256   :  { %522 = vmatmul.mubr.f32.gmra.mrb[12].mxu1 %v406_v9  ;;  %v2050_v43 = vadd.f32 %v1268_v17, %v382_v39  ;;  %v703_v17 = vld [vmem:[#allocation8 + $0x188] sm:$0xff] }
 0x257   :  { %527 = vmatprep.mubr.f32.mxu1 %v1825_v0  ;;  %v411_v47 = vmax.f32 %v2055_v44, 0.0  ;;  %1580 = vmatpush1.bf16.msra.mxu1 %v1579_v12  ;;  %v1585_v20 = vpack.c.bf16 %v705_v18, %v703_v17  ;;  %v1593_v12 = vpack.c.bf16 %v713_v10, %v711_v8  ;;  %v715_v17 = vld [vmem:[#allocation8 + $0x1e8] sm:$0xff]  ;;  %v717_v18 = vld [vmem:[#allocation8 + $0x1f8] sm:$0xff] }
 0x258   :  { %v410_v45 = vmax.f32 %v2050_v43, 0.0  ;;  %1582 = vmatprep.subr.bf16.mxu1 %v1581_v13  ;;  %v710_v13 = vld [vmem:[#allocation8 + $0x1c0] sm:$0xff] }
 0x259   :  { %v1595_v15 = vpack.c.bf16 %v712_v14, %v710_v13 }
 0x25a   :  { %528 = vmatmul.mubr.f32.gmra.mrb[14].mxu1 %v407_v6 }
 0x25b   :  { %533 = vmatprep.mubr.f32.mxu1 %v1825_v0  ;;  %1584 = vmatpush1.bf16.msra.mxu1 %v1583_v19  ;;  %v1597_v19 = vpack.c.bf16 %v717_v18, %v715_v17 }
 0x25c   :  { %1586 = vmatprep.subr.bf16.mxu1 %v1585_v20  ;;  %v714_v20 = vld [vmem:[#allocation8 + $0x1e0] sm:$0xff] }
 0x25d   :  { %v1599_v25 = vpack.c.bf16 %v716_v23, %v714_v20 }
 0x25e   :  { %534 = vmatmul.mubr.f32.gmra.mrb[16].mxu1 %v408_v42 }
 0x25f   :  { %539 = vmatprep.mubr.f32.mxu1 %v1825_v0  ;;  %1588 = vmatpush1.bf16.msra.mxu1 %v1587_v31 }
 0x260   :  { %1590 = vmatprep.subr.bf16.mxu1 %v1589_v62 }
 0x262   :  { %540 = vmatmul.mubr.f32.gmra.mrb[18].mxu1 %v409_v11 }
 0x263   :  { %545 = vmatprep.mubr.f32.mxu1 %v1825_v0  ;;  %1592 = vmatpush1.bf16.msra.mxu1 %v1591_v35 }
 0x264   :  { %1594 = vmatprep.subr.bf16.mxu1 %v1593_v12 }
 0x266   :  { %546 = vmatmul.mubr.f32.gmra.mrb[20].mxu1 %v410_v45 }
 0x267   :  { %551 = vmatprep.mubr.f32.mxu1 %v1825_v0  ;;  %1596 = vmatpush1.bf16.msra.mxu1 %v1595_v15 }
 0x268   :  { %1598 = vmatprep.subr.bf16.mxu1 %v1597_v19 }
 0x26a   :  { %552 = vmatmul.mubr.f32.gmra.mrb[22].mxu1 %v411_v47 }
 0x26b   :  { %784 = vmatprep.mubr.f32.mxu1 %v1825_v0  ;;  %1600 = vmatpush1.bf16.msra.mxu1 %v1599_v25 }
 0x321   :  { %v511_v1 = vpop.f32.mrb[8].mxu1 }
 0x322   :  { %v513_v36 = vpop.f32.mrb[9].mxu1 }
 0x325   :  { %v517_v39 = vpop.f32.mrb[10].mxu1 }
 0x326   :  { %v1553_v48 = vpack.c.bf16 %v517_v39, %v511_v1  ;;  %v519_v49 = vpop.f32.mrb[11].mxu1 }
 0x328   :  { %1554 = vmatprep.subr.bf16.mxu0 %v1553_v48 }
 0x329   :  { %v523_v50 = vpop.f32.mrb[12].mxu1  ;;  %1556 = vmatpush3.bf16.msra.mxu0 %v1553_v48 }
 0x32a   :  { %v525_v51 = vpop.f32.mrb[13].mxu1 }
 0x32d   :  { %v529_v52 = vpop.f32.mrb[14].mxu1 }
 0x32e   :  { %v1557_v53 = vpack.c.bf16 %v529_v52, %v523_v50  ;;  %v531_v54 = vpop.f32.mrb[15].mxu1 }
 0x330   :  { %1558 = vmatprep.subr.bf16.mxu0 %v1557_v53 }
 0x331   :  { %v535_v55 = vpop.f32.mrb[16].mxu1  ;;  %1560 = vmatpush3.bf16.msra.mxu0 %v1557_v53 }
 0x332   :  { %v537_v56 = vpop.f32.mrb[17].mxu1 }
 0x335   :  { %v541_v58 = vpop.f32.mrb[18].mxu1 }
 0x336   :  { %v1561_v60 = vpack.c.bf16 %v541_v58, %v535_v55  ;;  %v543_v61 = vpop.f32.mrb[19].mxu1 }
 0x338   :  { %1562 = vmatprep.subr.bf16.mxu0 %v1561_v60 }
 0x339   :  { %v547_v63 = vpop.f32.mrb[20].mxu1  ;;  %1564 = vmatpush3.bf16.msra.mxu0 %v1561_v60 }
 0x33a   :  { %v549_v2 = vpop.f32.mrb[21].mxu1 }
 0x33d   :  { %v553_v3 = vpop.f32.mrb[22].mxu1 }
 0x33e   :  { %v1565_v5 = vpack.c.bf16 %v553_v3, %v547_v63  ;;  %v555_v7 = vpop.f32.mrb[23].mxu1 }
 0x340   :  { %1566 = vmatprep.subr.bf16.mxu0 %v1565_v5 }
 0x341   :  { %1568 = vmatpush3.bf16.msra.mxu0 %v1565_v5 }
 0x344   :  { %1406 = vmatmul.mubr.msk.f32.vlgmr.msra.gmra.mrb[16].mxu0 %vm260_vm0, %v1977_v22 }
 0x345   :  { %1408 = vmatprep.mubr.msk.f32.mxu0 %vm260_vm0, %v1979_v24 }
 0x348   :  { %1409 = vmatmul.mubr.msk.f32.gmra.mrb[18].mxu0 %vm260_vm0, %v1985_v30 }
 0x349   :  { %1411 = vmatprep.mubr.msk.f32.mxu0 %vm260_vm0, %v1987_v32 }
 0x34c   :  { %1412 = vmatmul.mubr.msk.f32.gmra.mrb[20].mxu0 %vm260_vm0, %v1993_v38 }
 0x34d   :  { %1414 = vmatprep.mubr.msk.f32.mxu0 %vm260_vm0, %v1995_v40 }
 0x350   :  { %1415 = vmatmul.mubr.msk.f32.gmra.mrb[22].mxu0 %vm260_vm0, %v2001_v46 }
 0x351   :  { %1433 = vmatprep.mubr.msk.f32.mxu0 %vm260_vm0, %v1955_v57 }
 0x417   :  { %v1407_v26 = vpop.f32.mrb[16].mxu0 }
 0x418   :  { %v630_v31 = vadd.f32 %v1407_v26, %v519_v49  ;;  %v624_v62 = vpop.f32.mrb[17].mxu0 }
 0x419   :  { %v625_v33 = vadd.f32 %v624_v62, %v513_v36 }
 0x41a   :  { %v670_v48 = vadd.f32 %v1277_v29, %v630_v31 }
 0x41b   :  { %v669_v4 = vadd.f32 %v1277_v29, %v625_v33  ;;  %v1410_v35 = vpop.f32.mrb[18].mxu0 }
 0x41c   :  { %v640_v1 = vadd.f32 %v1410_v35, %v531_v54  ;;  %v634_v39 = vpop.f32.mrb[19].mxu0  ;;  %v678_v60 = vmax.f32 %v670_v48, 0.0 }
 0x41d   :  { %v677_v50 = vmax.f32 %v669_v4, 0.0  ;;  %v635_v52 = vadd.f32 %v634_v39, %v525_v51 }
 0x41e   :  { %v672_v54 = vadd.f32 %v1277_v29, %v640_v1 }
 0x41f   :  { %v1413_v53 = vpop.f32.mrb[20].mxu0  ;;  %785 = vmatmul.mubr.f32.vlgmr.msra.gmra.mrb[24].mxu1 %v677_v50  ;;  %v671_v63 = vadd.f32 %v1277_v29, %v635_v52  ;;  %v969_v50 = vld [vmem:[#allocation10 + $0x8] sm:$0xff]  ;;  %v971_v52 = vld [vmem:[#allocation10 + $0x18] sm:$0xff] }
 0x420   :  { %v650_v55 = vadd.f32 %v1413_v53, %v543_v61  ;;  %v644_v58 = vpop.f32.mrb[21].mxu0  ;;  %790 = vmatprep.mubr.f32.mxu1 %v1825_v0  ;;  %v680_v51 = vmax.f32 %v672_v54, 0.0 }
 0x421   :  { %v645_v3 = vadd.f32 %v644_v58, %v537_v56  ;;  %v679_v8 = vmax.f32 %v671_v63, 0.0  ;;  %v968_v63 = vld [vmem:[#allocation10] sm:$0xff] }
 0x422   :  { %v674_v12 = vadd.f32 %v1277_v29, %v650_v55 }
 0x423   :  { %v1416_v5 = vpop.f32.mrb[22].mxu0  ;;  %791 = vmatmul.mubr.f32.gmra.mrb[26].mxu1 %v678_v60  ;;  %v673_v61 = vadd.f32 %v1277_v29, %v645_v3  ;;  %v1617_v60 = vpack.c.bf16 %v971_v52, %v969_v50  ;;  %v970_v3 = vld [vmem:[#allocation10 + $0x10] sm:$0xff]  ;;  %v991_v50 = vld [vmem:[#allocation10 + $0xb8] sm:$0xff] }
 0x424   :  { %v660_v49 = vadd.f32 %v1416_v5, %v555_v7  ;;  %v654_v36 = vpop.f32.mrb[23].mxu0  ;;  %796 = vmatprep.mubr.f32.mxu1 %v1825_v0  ;;  %v682_v56 = vmax.f32 %v674_v12, 0.0  ;;  %v973_v5 = vld [vmem:[#allocation10 + $0x28] sm:$0xff] }
 0x425   :  { %v655_v10 = vadd.f32 %v654_v36, %v549_v2  ;;  %v681_v13 = vmax.f32 %v673_v61, 0.0  ;;  %v1619_v36 = vpack.c.bf16 %v970_v3, %v968_v63  ;;  %v979_v61 = vld [vmem:[#allocation10 + $0x58] sm:$0xff]  ;;  %v993_v3 = vld [vmem:[#allocation10 + $0xc8] sm:$0xff] }
 0x426   :  { %v676_v14 = vadd.f32 %v1277_v29, %v660_v49  ;;  %v975_v49 = vld [vmem:[#allocation10 + $0x38] sm:$0xff] }
 0x427   :  { %797 = vmatmul.mubr.f32.gmra.mrb[28].mxu1 %v679_v8  ;;  %v675_v7 = vadd.f32 %v1277_v29, %v655_v10  ;;  %v1621_v54 = vpack.c.bf16 %v975_v49, %v973_v5  ;;  %v972_v8 = vld [vmem:[#allocation10 + $0x20] sm:$0xff]  ;;  %v974_v10 = vld [vmem:[#allocation10 + $0x30] sm:$0xff]  ;;  %v995_v5 = vld [vmem:[#allocation10 + $0xd8] sm:$0xff] }
 0x428   :  { %802 = vmatprep.mubr.f32.mxu1 %v1825_v0  ;;  %v684_v15 = vmax.f32 %v676_v14, 0.0  ;;  %v1623_v12 = vpack.c.bf16 %v974_v10, %v972_v8  ;;  %v981_v14 = vld [vmem:[#allocation10 + $0x68] sm:$0xff]  ;;  %v1641_v49 = vpack.c.bf16 %v995_v5, %v993_v3 }
 0x429   :  { %v683_v2 = vmax.f32 %v675_v7, 0.0  ;;  %v978_v7 = vld [vmem:[#allocation10 + $0x50] sm:$0xff]  ;;  %v997_v10 = vld [vmem:[#allocation10 + $0xe8] sm:$0xff] }
 0x42b   :  { %803 = vmatmul.mubr.f32.gmra.mrb[30].mxu1 %v680_v51  ;;  %v977_v51 = vld [vmem:[#allocation10 + $0x48] sm:$0xff] }
 0x42c   :  { %808 = vmatprep.mubr.f32.mxu1 %v1825_v0 }
 0x42f   :  { %809 = vmatmul.mubr.f32.gmra.mrb[32].mxu1 %v681_v13  ;;  %v1625_v13 = vpack.c.bf16 %v979_v61, %v977_v51  ;;  %v999_v51 = vld [vmem:[#allocation10 + $0xf8] sm:$0xff] }
 0x430   :  { %814 = vmatprep.mubr.f32.mxu1 %v1825_v0  ;;  %v1645_v61 = vpack.c.bf16 %v999_v51, %v997_v10 }
 0x433   :  { %815 = vmatmul.mubr.f32.gmra.mrb[34].mxu1 %v682_v56  ;;  %v976_v56 = vld [vmem:[#allocation10 + $0x40] sm:$0xff] }
 0x434   :  { %820 = vmatprep.mubr.f32.mxu1 %v1825_v0 }
 0x437   :  { %821 = vmatmul.mubr.f32.gmra.mrb[36].mxu1 %v683_v2  ;;  %v983_v2 = vld [vmem:[#allocation10 + $0x78] sm:$0xff] }
 0x438   :  { %826 = vmatprep.mubr.f32.mxu1 %v1825_v0 }
 0x43b   :  { %827 = vmatmul.mubr.f32.gmra.mrb[38].mxu1 %v684_v15  ;;  %v1627_v15 = vpack.c.bf16 %v978_v7, %v976_v56 }
 0x43c   :  { %1461 = vmatprep.mubr.msk.f32.mxu1 %vm260_vm0, %v1955_v57 }
 0x4f2   :  { %v786_v17 = vpop.f32.mrb[24].mxu1 }
 0x4f3   :  { %v2093_v18 = vpop.f32.mrb[25].mxu1 }
 0x4f6   :  { %v792_v19 = vpop.f32.mrb[26].mxu1 }
 0x4f7   :  { %v1601_v20 = vpack.c.bf16 %v792_v19, %v786_v17  ;;  %v2095_v23 = vpop.f32.mrb[27].mxu1  ;;  %v1629_v17 = vpack.c.bf16 %v983_v2, %v981_v14  ;;  %v980_v19 = vld [vmem:[#allocation10 + $0x60] sm:$0xff] }
 0x4f8   :  { %v1287_v14 = vld [vmem:[%s2195_s5 + $0x1] ss:$0 sm:$0xff] }
 0x4f9   :  { %1602 = vmatprep.subr.bf16.mxu0 %v1601_v20 }
 0x4fa   :  { %v798_v25 = vpop.f32.mrb[28].mxu1  ;;  %1604 = vmatpush3.bf16.msra.mxu0 %v1601_v20  ;;  %v982_v20 = vld [vmem:[#allocation10 + $0x70] sm:$0xff] }
 0x4fb   :  { %v2097_v26 = vpop.f32.mrb[29].mxu1 }
 0x4fe   :  { %v804_v29 = vpop.f32.mrb[30].mxu1 }
 0x4ff   :  { %v1605_v31 = vpack.c.bf16 %v804_v29, %v798_v25  ;;  %v2099_v62 = vpop.f32.mrb[31].mxu1  ;;  %v985_v25 = vld [vmem:[#allocation10 + $0x88] sm:$0xff]  ;;  %v987_v29 = vld [vmem:[#allocation10 + $0x98] sm:$0xff] }
 0x501   :  { %1606 = vmatprep.subr.bf16.mxu0 %v1605_v31 }
 0x502   :  { %v810_v33 = vpop.f32.mrb[32].mxu1  ;;  %1608 = vmatpush3.bf16.msra.mxu0 %v1605_v31  ;;  %v1631_v31 = vpack.c.bf16 %v982_v20, %v980_v19 }
 0x503   :  { %v2101_v57 = vpop.f32.mrb[33].mxu1 }
 0x506   :  { %v816_v4 = vpop.f32.mrb[34].mxu1 }
 0x507   :  { %v1609_v35 = vpack.c.bf16 %v816_v4, %v810_v33  ;;  %v2103_v1 = vpop.f32.mrb[35].mxu1  ;;  %v1633_v33 = vpack.c.bf16 %v987_v29, %v985_v25  ;;  %v984_v4 = vld [vmem:[#allocation10 + $0x80] sm:$0xff] }
 0x509   :  { %1610 = vmatprep.subr.bf16.mxu0 %v1609_v35 }
 0x50a   :  { %v822_v39 = vpop.f32.mrb[36].mxu1  ;;  %1612 = vmatpush3.bf16.msra.mxu0 %v1609_v35  ;;  %v986_v35 = vld [vmem:[#allocation10 + $0x90] sm:$0xff] }
 0x50b   :  { %v2105_v48 = vpop.f32.mrb[37].mxu1  ;;  %v1635_v52 = vpack.c.bf16 %v986_v35, %v984_v4 }
 0x50e   :  { %v828_v53 = vpop.f32.mrb[38].mxu1 }
 0x50f   :  { %v1613_v55 = vpack.c.bf16 %v828_v53, %v822_v39  ;;  %v2107_v58 = vpop.f32.mrb[39].mxu1  ;;  %v989_v39 = vld [vmem:[#allocation10 + $0xa8] sm:$0xff] }
 0x510   :  { %v1637_v53 = vpack.c.bf16 %v991_v50, %v989_v39 }
 0x511   :  { %1614 = vmatprep.subr.bf16.mxu0 %v1613_v55 }
 0x512   :  { %1616 = vmatpush3.bf16.msra.mxu0 %v1613_v55  ;;  %v988_v55 = vld [vmem:[#allocation10 + $0xa0] sm:$0xff] }
 0x513   :  { %1618 = vmatprep.subr.bf16.mxu0 %v1617_v60  ;;  %v990_v60 = vld [vmem:[#allocation10 + $0xb0] sm:$0xff] }
 0x514   :  { %v1639_v63 = vpack.c.bf16 %v990_v60, %v988_v55 }
 0x515   :  { %1434 = vmatmul.mubr.msk.f32.vlgmr.msra.gmra.mrb[24].mxu0 %vm260_vm0, %v1977_v22 }
 0x516   :  { %1436 = vmatprep.mubr.msk.f32.mxu0 %vm260_vm0, %v1979_v24  ;;  %1620 = vmatpush1.bf16.msra.mxu0 %v1619_v36  ;;  %v992_v36 = vld [vmem:[#allocation10 + $0xc0] sm:$0xff] }
 0x517   :  { %1622 = vmatprep.subr.bf16.mxu0 %v1621_v54  ;;  %v994_v54 = vld [vmem:[#allocation10 + $0xd0] sm:$0xff] }
 0x518   :  { %v1643_v8 = vpack.c.bf16 %v994_v54, %v992_v36 }
 0x519   :  { %1437 = vmatmul.mubr.msk.f32.gmra.mrb[26].mxu0 %vm260_vm0, %v1985_v30 }
 0x51a   :  { %1439 = vmatprep.mubr.msk.f32.mxu0 %vm260_vm0, %v1987_v32  ;;  %1624 = vmatpush1.bf16.msra.mxu0 %v1623_v12  ;;  %v996_v12 = vld [vmem:[#allocation10 + $0xe0] sm:$0xff] }
 0x51b   :  { %1626 = vmatprep.subr.bf16.mxu0 %v1625_v13  ;;  %v998_v13 = vld [vmem:[#allocation10 + $0xf0] sm:$0xff] }
 0x51c   :  { %v1647_v56 = vpack.c.bf16 %v998_v13, %v996_v12 }
 0x51d   :  { %1440 = vmatmul.mubr.msk.f32.gmra.mrb[28].mxu0 %vm260_vm0, %v1993_v38 }
 0x51e   :  { %1442 = vmatprep.mubr.msk.f32.mxu0 %vm260_vm0, %v1995_v40  ;;  %1628 = vmatpush1.bf16.msra.mxu0 %v1627_v15 }
 0x51f   :  { %1630 = vmatprep.subr.bf16.mxu0 %v1629_v17 }
 0x521   :  { %1443 = vmatmul.mubr.msk.f32.gmra.mrb[30].mxu0 %vm260_vm0, %v2001_v46 }
 0x522   :  { %1632 = vmatpush1.bf16.msra.mxu0 %v1631_v31  ;;  %1065 = vmatprep.mubr.f32.mxu0 %v1825_v0 }
 0x523   :  { %1634 = vmatprep.subr.bf16.mxu0 %v1633_v33 }
 0x526   :  { %1636 = vmatpush1.bf16.msra.mxu0 %v1635_v52 }
 0x527   :  { %1638 = vmatprep.subr.bf16.mxu0 %v1637_v53 }
 0x52a   :  { %1640 = vmatpush1.bf16.msra.mxu0 %v1639_v63 }
 0x52b   :  { %1642 = vmatprep.subr.bf16.mxu0 %v1641_v49 }
 0x52e   :  { %1644 = vmatpush1.bf16.msra.mxu0 %v1643_v8 }
 0x52f   :  { %1646 = vmatprep.subr.bf16.mxu0 %v1645_v61 }
 0x532   :  { %1648 = vmatpush1.bf16.msra.mxu0 %v1647_v56 }
 0x5e8   :  { %v1435_v7 = vpop.f32.mrb[24].mxu0 }
 0x5e9   :  { %v905_v2 = vadd.f32 %v1435_v7, %v2095_v23  ;;  %v899_v15 = vpop.f32.mrb[25].mxu0 }
 0x5ea   :  { %v900_v17 = vadd.f32 %v899_v15, %v2093_v18 }
 0x5eb   :  { %v945_v19 = vadd.f32 %v1287_v14, %v905_v2 }
 0x5ec   :  { %v944_v20 = vadd.f32 %v1287_v14, %v900_v17  ;;  %v1438_v25 = vpop.f32.mrb[26].mxu0 }
 0x5ed   :  { %v915_v29 = vadd.f32 %v1438_v25, %v2099_v62  ;;  %v909_v31 = vpop.f32.mrb[27].mxu0  ;;  %v953_v35 = vmax.f32 %v945_v19, 0.0 }
 0x5ee   :  { %v952_v33 = vmax.f32 %v944_v20, 0.0  ;;  %v910_v4 = vadd.f32 %v909_v31, %v2097_v26 }
 0x5ef   :  { %v947_v55 = vadd.f32 %v1287_v14, %v915_v29  ;;  %v961_v26 = vadd.f32 %v953_v35, %v405_v59 }
 0x5f0   :  { %v960_v39 = vadd.f32 %v952_v33, %v404_v28  ;;  %v946_v50 = vadd.f32 %v1287_v14, %v910_v4  ;;  %v1441_v52 = vpop.f32.mrb[28].mxu0 }
 0x5f1   :  { %v925_v23 = vadd.f32 %v1441_v52, %v2103_v1  ;;  %v919_v53 = vpop.f32.mrb[29].mxu0  ;;  %v955_v1 = vmax.f32 %v947_v55, 0.0 }
 0x5f2   :  { %v920_v18 = vadd.f32 %v919_v53, %v2101_v57  ;;  %1066 = vmatmul.mubr.f32.vlgmr.msra.gmra.mrb[32].mxu0 %v960_v39  ;;  %v954_v62 = vmax.f32 %v946_v50, 0.0 }
 0x5f3   :  { %1071 = vmatprep.mubr.f32.mxu0 %v1825_v0  ;;  %v949_v5 = vadd.f32 %v1287_v14, %v925_v23  ;;  %v963_v27 = vadd.f32 %v955_v1, %v407_v6 }
 0x5f4   :  { %v1444_v60 = vpop.f32.mrb[30].mxu0  ;;  %v948_v3 = vadd.f32 %v1287_v14, %v920_v18  ;;  %v962_v57 = vadd.f32 %v954_v62, %v406_v9 }
 0x5f5   :  { %v935_v63 = vadd.f32 %v1444_v60, %v2107_v58  ;;  %v929_v21 = vpop.f32.mrb[31].mxu0  ;;  %v957_v59 = vmax.f32 %v949_v5, 0.0 }
 0x5f6   :  { %v930_v28 = vadd.f32 %v929_v21, %v2105_v48  ;;  %1072 = vmatmul.mubr.f32.gmra.mrb[34].mxu0 %v961_v26  ;;  %v956_v49 = vmax.f32 %v948_v3, 0.0 }
 0x5f7   :  { %1077 = vmatprep.mubr.f32.mxu0 %v1825_v0  ;;  %v951_v34 = vadd.f32 %v1287_v14, %v935_v63  ;;  %v965_v36 = vadd.f32 %v957_v59, %v409_v11 }
 0x5f8   :  { %v950_v48 = vadd.f32 %v1287_v14, %v930_v28  ;;  %v964_v58 = vadd.f32 %v956_v49, %v408_v42 }
 0x5f9   :  { %v959_v37 = vmax.f32 %v951_v34, 0.0 }
 0x5fa   :  { %1078 = vmatmul.mubr.f32.gmra.mrb[36].mxu0 %v962_v57  ;;  %v958_v9 = vmax.f32 %v950_v48, 0.0 }
 0x5fb   :  { %1083 = vmatprep.mubr.f32.mxu0 %v1825_v0  ;;  %v967_v41 = vadd.f32 %v959_v37, %v411_v47 }
 0x5fc   :  { %v966_v6 = vadd.f32 %v958_v9, %v410_v45 }
 0x5fe   :  { %1084 = vmatmul.mubr.f32.gmra.mrb[38].mxu0 %v963_v27 }
 0x5ff   :  { %1089 = vmatprep.mubr.f32.mxu0 %v1825_v0 }
 0x602   :  { %1090 = vmatmul.mubr.f32.gmra.mrb[40].mxu0 %v964_v58 }
 0x603   :  { %1095 = vmatprep.mubr.f32.mxu0 %v1825_v0 }
 0x606   :  { %1096 = vmatmul.mubr.f32.gmra.mrb[42].mxu0 %v965_v36 }
 0x607   :  { %1101 = vmatprep.mubr.f32.mxu0 %v1825_v0 }
 0x60a   :  { %1102 = vmatmul.mubr.f32.gmra.mrb[44].mxu0 %v966_v6 }
 0x60b   :  { %1107 = vmatprep.mubr.f32.mxu0 %v1825_v0 }
 0x60e   :  { %1108 = vmatmul.mubr.f32.gmra.mrb[46].mxu0 %v967_v41 }
 0x6c5   :  { %v1067_v42 = vpop.f32.mrb[32].mxu0 }
 0x6c6   :  { %v1069_v54 = vpop.f32.mrb[33].mxu0 }
 0x6c9   :  { %v1073_v8 = vpop.f32.mrb[34].mxu0 }
 0x6ca   :  { %v1649_v10 = vpack.c.bf16 %v1073_v8, %v1067_v42  ;;  %v1075_v16 = vpop.f32.mrb[35].mxu0 }
 0x6cc   :  { %1650 = vmatprep.subr.bf16.mxu1 %v1649_v10 }
 0x6cd   :  { %v1079_v11 = vpop.f32.mrb[36].mxu0  ;;  %1652 = vmatpush3.bf16.msra.mxu1 %v1649_v10 }
 0x6ce   :  { %v1081_v51 = vpop.f32.mrb[37].mxu0 }
 0x6d1   :  { %v1085_v61 = vpop.f32.mrb[38].mxu0 }
 0x6d2   :  { %v1653_v12 = vpack.c.bf16 %v1085_v61, %v1079_v11  ;;  %v1087_v43 = vpop.f32.mrb[39].mxu0 }
 0x6d4   :  { %1654 = vmatprep.subr.bf16.mxu1 %v1653_v12 }
 0x6d5   :  { %v1091_v45 = vpop.f32.mrb[40].mxu0  ;;  %1656 = vmatpush3.bf16.msra.mxu1 %v1653_v12 }
 0x6d6   :  { %v1093_v0 = vpop.f32.mrb[41].mxu0 }
 0x6d9   :  { %v1097_v13 = vpop.f32.mrb[42].mxu0 }
 0x6da   :  { %v1657_v44 = vpack.c.bf16 %v1097_v13, %v1091_v45  ;;  %v1099_v47 = vpop.f32.mrb[43].mxu0 }
 0x6dc   :  { %1658 = vmatprep.subr.bf16.mxu1 %v1657_v44 }
 0x6dd   :  { %v1103_v56 = vpop.f32.mrb[44].mxu0  ;;  %1660 = vmatpush3.bf16.msra.mxu1 %v1657_v44 }
 0x6de   :  { %v1105_v7 = vpop.f32.mrb[45].mxu0 }
 0x6e1   :  { %v1109_v14 = vpop.f32.mrb[46].mxu0 }
 0x6e2   :  { %v1661_v2 = vpack.c.bf16 %v1109_v14, %v1103_v56  ;;  %v1111_v15 = vpop.f32.mrb[47].mxu0 }
 0x6e4   :  { %1662 = vmatprep.subr.bf16.mxu1 %v1661_v2 }
 0x6e5   :  { %1664 = vmatpush3.bf16.msra.mxu1 %v1661_v2 }
 0x6e8   :  { %1462 = vmatmul.mubr.msk.f32.vlgmr.msra.gmra.mrb[40].mxu1 %vm260_vm0, %v1977_v22  ;;  %v1296_v22 = vld [vmem:[%s2197_s7] ss:$0 sm:$0xff]  ;;  %s1826_s7 = smov [#allocation11]  }
 0x6e9   :  { %1464 = vmatprep.mubr.msk.f32.mxu1 %vm260_vm0, %v1979_v24  ;;  %s1246_s30 = sshll.u32 %s1826_s7, 4  ;;  %s1247_s30 = int_to_ptr.vmem [resolvable:$true] %s1246_s30 }
 0x6ea   :  { %s1786_s1 = scalar_lea.vmem %s1247_s30, 1024  ;;  %p1791_p13 = scmp.lt.s32.totalorder %s1247_s30, %s1247_s30 }
 0x6eb   :  { %p1787_p12 = scmp.ne.s32.totalorder %s1247_s30, %s1786_s1  ;;  %p1792_p0 = scmp.lt.s32.totalorder %s1786_s1, %s1786_s1 }
 0x6ec   :  { %1465 = vmatmul.mubr.msk.f32.gmra.mrb[42].mxu1 %vm260_vm0, %v1985_v30 }
 0x6ed   :  { %1467 = vmatprep.mubr.msk.f32.mxu1 %vm260_vm0, %v1987_v32  ;;  %p1793_p1 = por %p1792_p0, %p1791_p13 }
 0x6ef   :  { %p1794_p2 = pnand %p1793_p1, %p1787_p12 }
 0x6f0   :  { %1468 = vmatmul.mubr.msk.f32.gmra.mrb[44].mxu1 %vm260_vm0, %v1993_v38 }
 0x6f1   :  { %1470 = vmatprep.mubr.msk.f32.mxu1 %vm260_vm0, %v1995_v40 }
 0x6f4   :  { %1471 = vmatmul.mubr.msk.f32.gmra.mrb[46].mxu1 %vm260_vm0, %v2001_v46 }
 0x7bb   :  { %v1463_v24 = vpop.f32.mrb[40].mxu1 }
 0x7bc   :  { %v1186_v17 = vadd.f32 %v1463_v24, %v1075_v16  ;;  %v1180_v19 = vpop.f32.mrb[41].mxu1 }
 0x7bd   :  { %v1181_v30 = vadd.f32 %v1180_v19, %v1069_v54 }
 0x7be   :  { %v1226_v20 = vadd.f32 %v1296_v22, %v1186_v17 }
 0x7bf   :  { %v1225_v25 = vadd.f32 %v1296_v22, %v1181_v30  ;;  %v1466_v32 = vpop.f32.mrb[42].mxu1 }
 0x7c0   :  { %1234 = vst [vmem:[#allocation11 + $0x8] sm:$0xff] %v1226_v20  ;;  %v1196_v29 = vadd.f32 %v1466_v32, %v1087_v43  ;;  %v1190_v38 = vpop.f32.mrb[43].mxu1 }
 0x7c1   :  { %1233 = vst [vmem:[#allocation11] sm:$0xff] %v1225_v25  ;;  %v1191_v31 = vadd.f32 %v1190_v38, %v1081_v51 }
 0x7c2   :  { %v1228_v40 = vadd.f32 %v1296_v22, %v1196_v29 }
 0x7c3   :  { %v1227_v33 = vadd.f32 %v1296_v22, %v1191_v31  ;;  %v1469_v4 = vpop.f32.mrb[44].mxu1 }
 0x7c4   :  { %1236 = vst [vmem:[#allocation11 + $0x18] sm:$0xff] %v1228_v40  ;;  %v1206_v46 = vadd.f32 %v1469_v4, %v1099_v47  ;;  %v1200_v35 = vpop.f32.mrb[45].mxu1 }
 0x7c5   :  { %1235 = vst [vmem:[#allocation11 + $0x10] sm:$0xff] %v1227_v33  ;;  %v1201_v39 = vadd.f32 %v1200_v35, %v1093_v0 }
 0x7c6   :  { %v1230_v50 = vadd.f32 %v1296_v22, %v1206_v46 }
 0x7c7   :  { %v1229_v52 = vadd.f32 %v1296_v22, %v1201_v39  ;;  %v1472_v23 = vpop.f32.mrb[46].mxu1 }
 0x7c8   :  { %1238 = vst [vmem:[#allocation11 + $0x28] sm:$0xff] %v1230_v50  ;;  %v1216_v53 = vadd.f32 %v1472_v23, %v1111_v15  ;;  %v1210_v18 = vpop.f32.mrb[47].mxu1 }
 0x7c9   :  { %1237 = vst [vmem:[#allocation11 + $0x20] sm:$0xff] %v1229_v52  ;;  %v1211_v55 = vadd.f32 %v1210_v18, %v1105_v7 }
 0x7ca   :  { %v1232_v62 = vadd.f32 %v1296_v22, %v1216_v53 }
 0x7cb   :  { %v1231_v60 = vadd.f32 %v1296_v22, %v1211_v55 }
 0x7cc   :  { %1240 = vst [vmem:[#allocation11 + $0x38] sm:$0xff] %v1232_v62 }
 0x7cd   :  { %1239 = vst [vmem:[#allocation11 + $0x30] sm:$0xff] %v1231_v60 }
 0x7ce   :  { %1797 = shalt.err (!%p1794_p2)
}
 0x7cf   :  { %s1798_s12 = scalar_lea.hbm %s2198_s8, 1024 }
 0x7d0   :  { %p1799_p3 = scmp.ne.s32.totalorder %s2198_s8, %s1798_s12  ;;  %p1802_p4 = scmp.lt.u32.totalorder %s1798_s12, %s2198_s8 }
 0x7d2   :  { %p1804_p5 = pnand %p1802_p4, %p1799_p3 }
 0x7d4   :  { %1807 = shalt.err (!%p1804_p5)
}
 0x7d5   :  { %1252 = dma.vmem_to_hbm [thread:$0]  %s1247_s30, 1024, %s2198_s8, [#allocation4], %s1817_s15, %s1817_s15, %s1818_s16  }
 0x7d6   :  { %1814 = dma.done.wait [#allocation4], 1024  }
 0x7d7   :  { %1815 = vsyncadd [#allocation4], 4294966272 }
 0x7d8   :  { %1256 = vsyncpa [#allocation3], 1 }
 0x7d9   :  { %1257 = vsyncpa [#allocation6], 1 }
 0x7da   :  { %1258 = vsyncpa [#allocation9], 1 }
 0x7db   :  { %1259 = vsyncpa [#allocation4], 1 }

</bundles_post_ra>
